<compile_context>
chip_gen: v7x
topology: tpu7x:2x2x1
jax: 0.10.0
libtpu: 0.0.40
codegen_flags: <defaults>
</compile_context>

<pallas_src>
import jax
import jax.numpy as jnp
from jax.experimental import pallas as pl
from jax.experimental.pallas import tpu as pltpu


def _round_up(x, m):
    return ((x + m - 1) // m) * m


def bottleneck_kernel(x_ref, w1_ref, b1_ref, w2_ref, b2_ref, o_ref):
    # x:  (TM, H)       w1: (H, HID)    b1: (1, HID)  [f32]
    # w2: (HID, OUT)    b2: (1, OUT)    [f32]         o: (TM, OUT)
    # Linear 1: x @ W1 (pre-transposed) + b1; f32 accumulation on the MXU.
    h = jnp.dot(x_ref[...], w1_ref[...], preferred_element_type=jnp.float32)
    h = jnp.maximum(h + b1_ref[...], 0.0)          # bias + ReLU, f32 epilogue

    # Dropout(p) in eval mode == identity (no compute).

    # Linear 2 (last layer, no ReLU).  Feed the MXU in the weight dtype
    # (bf16 weights -> bf16 operands at full MXU rate; f32 weights -> f32).
    y = jnp.dot(h.astype(w2_ref.dtype), w2_ref[...],
                preferred_element_type=jnp.float32)
    o_ref[...] = (y + b2_ref[...]).astype(o_ref.dtype)


def prepare_bottleneck_params(w1, b1, w2, b2, compute_dtype=None):
    """One-time parameter relayout (hoisted out of the per-call forward path).

    w1: (HID, H), b1: (HID,), w2: (OUT, HID), b2: (OUT,)  -- nn.Linear layout.
    Weights are transposed to (in, out) so the kernel computes x @ W directly
    (no in-kernel .T / XLU relayout).  Biases become f32 row vectors added to
    the f32 accumulator.  compute_dtype=jnp.bfloat16 enables bf16 MXU feeding.
    """
    w1_t = w1.T      # (H, HID)
    w2_t = w2.T      # (HID, OUT)
    if compute_dtype is not None:
        w1_t = w1_t.astype(compute_dtype)
        w2_t = w2_t.astype(compute_dtype)
    return {
        "w1_t": w1_t,
        "w2_t": w2_t,
        "b1": b1.astype(jnp.float32).reshape(1, -1),
        "b2": b2.astype(jnp.float32).reshape(1, -1),
    }


def bottleneck_forward(x, params, *, tm=512):
    """x: (B, S, H) -> (B, S, OUT).  Fused Linear -> ReLU -> (Dropout id) -> Linear."""
    w1_t, b1_2d = params["w1_t"], params["b1"]
    w2_t, b2_2d = params["w2_t"], params["b2"]

    B, S, H = x.shape
    Hw, HID = w1_t.shape
    assert Hw == H, "weight/input feature mismatch"
    OUT = w2_t.shape[1]
    M = B * S
    out_dtype = x.dtype
    compute_dtype = w1_t.dtype

    x2d = x.reshape(M, H)
    if x2d.dtype != compute_dtype:
        x2d = x2d.astype(compute_dtype)           # halves x DMA bytes when bf16

    # Row tile: multiple of the sublane pack (8 for 4B dtypes, 16 for bf16), and
    # small enough that the grid has >= 2 steps (v7x megacore + DMA overlap).
    isz = jnp.dtype(compute_dtype).itemsize
    osz = jnp.dtype(out_dtype).itemsize
    sub = 8 * max(1, 4 // isz)
    TM = max(sub, min(tm, _round_up(pl.cdiv(M, 2), sub)))
    num_m = pl.cdiv(M, TM)

    # VMEM budget: actual tile footprint (x/out double-buffered, weights single)
    # with 2x margin + 4 MiB slack, capped at 48 MiB (headroom on v7x's 64 MiB).
    need = (2 * TM * H * isz + 2 * TM * OUT * osz            # pipelined x / out
            + (H * HID + HID * OUT) * isz                    # resident weights
            + (HID + OUT) * 4                                # resident biases
            + TM * (HID + OUT) * 4)                          # f32 intermediates
    vmem_limit = min(48 << 20, _round_up(2 * need + (4 << 20), 1 << 20))

    flops = 2 * M * (H * HID + HID * OUT)
    bytes_accessed = (M * H * isz + (H * HID + HID * OUT) * isz
                      + (HID + OUT) * 4 + M * OUT * osz)

    def run(single_buffer_weights):
        resident = (dict(pipeline_mode=pl.Buffered(1))
                    if single_buffer_weights else {})
        return pl.pallas_call(
            bottleneck_kernel,
            out_shape=jax.ShapeDtypeStruct((M, OUT), out_dtype),
            grid_spec=pltpu.PrefetchScalarGridSpec(
                num_scalar_prefetch=0,
                grid=(num_m,),
                in_specs=[
                    pl.BlockSpec((TM, H), lambda i: (i, 0)),           # x (pipelined)
                    pl.BlockSpec((H, HID), lambda i: (0, 0), **resident),   # W1
                    pl.BlockSpec((1, HID), lambda i: (0, 0), **resident),   # b1
                    pl.BlockSpec((HID, OUT), lambda i: (0, 0), **resident),  # W2
                    pl.BlockSpec((1, OUT), lambda i: (0, 0), **resident),    # b2
                ],
                out_specs=pl.BlockSpec((TM, OUT), lambda i: (i, 0)),
            ),
            compiler_params=pltpu.CompilerParams(
                dimension_semantics=("parallel",),
                vmem_limit_bytes=vmem_limit,
            ),
            cost_estimate=pl.CostEstimate(
                flops=flops, transcendentals=0, bytes_accessed=bytes_accessed),
        )(x2d, w1_t, b1_2d, w2_t, b2_2d)

    try:
        out2d = run(True)
    except Exception:
        # Fallback if this JAX build rejects single-buffering (pl.Buffered(1)).
        out2d = run(False)

    return out2d.reshape(B, S, OUT)


def init_linear_params(key, in_features, out_features, dtype=jnp.float32):
    """Deterministic init mimicking nn.Linear default (uniform +/- 1/sqrt(in))."""
    kw, kb = jax.random.split(key)
    bound = 1.0 / jnp.sqrt(jnp.array(in_features, dtype=jnp.float32))
    w = jax.random.uniform(kw, (out_features, in_features), dtype,
                           minval=-bound, maxval=bound)
    b = jax.random.uniform(kb, (out_features,), dtype,
                           minval=-bound, maxval=bound)
    return w, b


if __name__ == "__main__":
    # stacks = [
    #   {'method': 'Linear', 'input_size': 32, 'output_size': 64},
    #   {'method': 'Dropout', 'dropout_rate': 0.1},
    #   {'method': 'Linear', 'input_size': 64, 'output_size': 16},
    # ]
    B, S, H, HID, OUT = 2, 8, 32, 64, 16

    key = jax.random.PRNGKey(0)
    kx, k1, k2 = jax.random.split(key, 3)

    x = jax.random.normal(kx, (B, S, H), jnp.float32)
    w1, b1 = init_linear_params(k1, H, HID)
    w2, b2 = init_linear_params(k2, HID, OUT)

    # Reference in plain JAX (same semantics as PyTorch forward in eval mode).
    h_ref = jnp.maximum(x.reshape(-1, H) @ w1.T + b1, 0.0)
    y_ref = (h_ref @ w2.T + b2).reshape(B, S, OUT)

    # --- f32 path (exact) -------------------------------------------------
    params_f32 = prepare_bottleneck_params(w1, b1, w2, b2)          # hoisted, one-time
    out_f32 = jax.block_until_ready(bottleneck_forward(x, params_f32))
    assert out_f32.shape == (B, S, OUT)
    assert jnp.allclose(out_f32, y_ref, atol=1e-5, rtol=1e-5)

    # --- bf16 MXU-feeding path (mixed precision, f32 accumulation) --------
    params_bf16 = prepare_bottleneck_params(w1, b1, w2, b2,
                                            compute_dtype=jnp.bfloat16)
    out_bf16 = jax.block_until_ready(bottleneck_forward(x, params_bf16))
    assert out_bf16.shape == (B, S, OUT)
    assert jnp.allclose(out_bf16, y_ref, atol=7.5e-2, rtol=7.5e-2)

    print("KERNEL_OK")
</pallas_src>

<mosaic_0001>
module attributes {stable_mosaic.version = 11 : i64} {
  func.func @bottleneck_kernel(%arg0: i32, %arg1: memref<8x32xf32, #tpu.memory_space<vmem>>, %arg2: memref<32x64xf32, #tpu.memory_space<vmem>>, %arg3: memref<1x64xf32, #tpu.memory_space<vmem>>, %arg4: memref<64x16xf32, #tpu.memory_space<vmem>>, %arg5: memref<1x16xf32, #tpu.memory_space<vmem>>, %arg6: memref<8x16xf32, #tpu.memory_space<vmem>>) attributes {dimension_semantics = [#tpu.dimension_semantics<parallel>], iteration_bounds = array<i64: 2>, scalar_prefetch = 0 : i64, scratch_operands = 0 : i64, tpu.core_type = #tpu.core_type<tc>, window_params = [{transform_indices = @transform_0, window_bounds = array<i64: 8, 32>}, {pipeline_mode = #tpu.pipeline_mode<synchronous>, transform_indices = @transform_1, window_bounds = array<i64: 32, 64>}, {pipeline_mode = #tpu.pipeline_mode<synchronous>, transform_indices = @transform_2, window_bounds = array<i64: 1, 64>}, {pipeline_mode = #tpu.pipeline_mode<synchronous>, transform_indices = @transform_3, window_bounds = array<i64: 64, 16>}, {pipeline_mode = #tpu.pipeline_mode<synchronous>, transform_indices = @transform_4, window_bounds = array<i64: 1, 16>}, {transform_indices = @transform_5, window_bounds = array<i64: 8, 16>}]} {
    %c0 = arith.constant 0 : index
    %c0_0 = arith.constant 0 : index
    %0 = vector.load %arg1[%c0, %c0_0] : memref<8x32xf32, #tpu.memory_space<vmem>>, vector<8x32xf32>
    %c0_1 = arith.constant 0 : index
    %c0_2 = arith.constant 0 : index
    %1 = vector.load %arg2[%c0_1, %c0_2] : memref<32x64xf32, #tpu.memory_space<vmem>>, vector<32x64xf32>
    %cst = arith.constant dense<0.000000e+00> : vector<8x64xf32>
    %2 = tpu.matmul %0, %1, %cst {dimension_numbers = #tpu.dot_dimension_numbers<[1], [0], [0], [1], [0, 0, 1, 1], [], []>} : vector<8x32xf32>, vector<32x64xf32>, vector<8x64xf32> -> vector<8x64xf32>
    %c0_3 = arith.constant 0 : index
    %c0_4 = arith.constant 0 : index
    %3 = vector.load %arg3[%c0_3, %c0_4] : memref<1x64xf32, #tpu.memory_space<vmem>>, vector<1x64xf32>
    %4 = vector.broadcast %3 : vector<1x64xf32> to vector<8x64xf32>
    %5 = arith.addf %2, %4 : vector<8x64xf32>
    %cst_5 = arith.constant 0.000000e+00 : f32
    %6 = vector.broadcast %cst_5 : f32 to vector<8x64xf32>
    %7 = arith.maximumf %5, %6 : vector<8x64xf32>
    %c0_6 = arith.constant 0 : index
    %c0_7 = arith.constant 0 : index
    %8 = vector.load %arg4[%c0_6, %c0_7] : memref<64x16xf32, #tpu.memory_space<vmem>>, vector<64x16xf32>
    %cst_8 = arith.constant dense<0.000000e+00> : vector<8x16xf32>
    %9 = tpu.matmul %7, %8, %cst_8 {dimension_numbers = #tpu.dot_dimension_numbers<[1], [0], [0], [1], [0, 0, 1, 1], [], []>} : vector<8x64xf32>, vector<64x16xf32>, vector<8x16xf32> -> vector<8x16xf32>
    %c0_9 = arith.constant 0 : index
    %c0_10 = arith.constant 0 : index
    %10 = vector.load %arg5[%c0_9, %c0_10] : memref<1x16xf32, #tpu.memory_space<vmem>>, vector<1x16xf32>
    %11 = vector.broadcast %10 : vector<1x16xf32> to vector<8x16xf32>
    %12 = arith.addf %9, %11 : vector<8x16xf32>
    %c0_11 = arith.constant 0 : index
    %c0_12 = arith.constant 0 : index
    %13 = vector.load %arg6[%c0_11, %c0_12] : memref<8x16xf32, #tpu.memory_space<vmem>>, vector<8x16xf32>
    tpu.vector_store %arg6[%c0_11, %c0_12], %12 {strides = array<i32>} : memref<8x16xf32, #tpu.memory_space<vmem>>, vector<8x16xf32>,
    return
  }
  func.func @transform_0(%arg0: i32) -> (i32, i32) {
    %c0_i32 = arith.constant 0 : i32
    %c0_i32_0 = arith.constant 0 : i32
    return %arg0, %c0_i32 : i32, i32
  }
  func.func @transform_1(%arg0: i32) -> (i32, i32) {
    %c0_i32 = arith.constant 0 : i32
    %c0_i32_0 = arith.constant 0 : i32
    %c0_i32_1 = arith.constant 0 : i32
    return %c0_i32, %c0_i32_0 : i32, i32
  }
  func.func @transform_2(%arg0: i32) -> (i32, i32) {
    %c0_i32 = arith.constant 0 : i32
    %c0_i32_0 = arith.constant 0 : i32
    %c0_i32_1 = arith.constant 0 : i32
    return %c0_i32, %c0_i32_0 : i32, i32
  }
  func.func @transform_3(%arg0: i32) -> (i32, i32) {
    %c0_i32 = arith.constant 0 : i32
    %c0_i32_0 = arith.constant 0 : i32
    %c0_i32_1 = arith.constant 0 : i32
    return %c0_i32, %c0_i32_0 : i32, i32
  }
  func.func @transform_4(%arg0: i32) -> (i32, i32) {
    %c0_i32 = arith.constant 0 : i32
    %c0_i32_0 = arith.constant 0 : i32
    %c0_i32_1 = arith.constant 0 : i32
    return %c0_i32, %c0_i32_0 : i32, i32
  }
  func.func @transform_5(%arg0: i32) -> (i32, i32) {
    %c0_i32 = arith.constant 0 : i32
    %c0_i32_0 = arith.constant 0 : i32
    return %arg0, %c0_i32 : i32, i32
  }
}

module attributes {stable_mosaic.version = 11 : i64} {
  func.func @bottleneck_kernel(%arg0: i32, %arg1: memref<8x32xf32, #tpu.memory_space<vmem>>, %arg2: memref<32x64xf32, #tpu.memory_space<vmem>>, %arg3: memref<1x64xf32, #tpu.memory_space<vmem>>, %arg4: memref<64x16xf32, #tpu.memory_space<vmem>>, %arg5: memref<1x16xf32, #tpu.memory_space<vmem>>, %arg6: memref<8x16xf32, #tpu.memory_space<vmem>>) attributes {dimension_semantics = [#tpu.dimension_semantics<parallel>], iteration_bounds = array<i64: 2>, scalar_prefetch = 0 : i64, scratch_operands = 0 : i64, tpu.core_type = #tpu.core_type<tc>, window_params = [{transform_indices = @transform_0, window_bounds = array<i64: 8, 32>}, {pipeline_mode = #tpu.pipeline_mode<synchronous>, transform_indices = @transform_1, window_bounds = array<i64: 32, 64>}, {pipeline_mode = #tpu.pipeline_mode<synchronous>, transform_indices = @transform_2, window_bounds = array<i64: 1, 64>}, {pipeline_mode = #tpu.pipeline_mode<synchronous>, transform_indices = @transform_3, window_bounds = array<i64: 64, 16>}, {pipeline_mode = #tpu.pipeline_mode<synchronous>, transform_indices = @transform_4, window_bounds = array<i64: 1, 16>}, {transform_indices = @transform_5, window_bounds = array<i64: 8, 16>}]} {
    %c0 = arith.constant 0 : index
    %c0_0 = arith.constant 0 : index
    %0 = vector.load %arg1[%c0, %c0_0] : memref<8x32xf32, #tpu.memory_space<vmem>>, vector<8x32xf32>
    %c0_1 = arith.constant 0 : index
    %c0_2 = arith.constant 0 : index
    %1 = vector.load %arg2[%c0_1, %c0_2] : memref<32x64xf32, #tpu.memory_space<vmem>>, vector<32x64xf32>
    %cst = arith.constant dense<0.000000e+00> : vector<8x64xf32>
    %2 = tpu.matmul %0, %1, %cst {dimension_numbers = #tpu.dot_dimension_numbers<[1], [0], [0], [1], [0, 0, 1, 1], [], []>} : vector<8x32xf32>, vector<32x64xf32>, vector<8x64xf32> -> vector<8x64xf32>
    %c0_3 = arith.constant 0 : index
    %c0_4 = arith.constant 0 : index
    %3 = vector.load %arg3[%c0_3, %c0_4] : memref<1x64xf32, #tpu.memory_space<vmem>>, vector<1x64xf32>
    %4 = vector.broadcast %3 : vector<1x64xf32> to vector<8x64xf32>
    %5 = arith.addf %2, %4 : vector<8x64xf32>
    %cst_5 = arith.constant 0.000000e+00 : f32
    %6 = vector.broadcast %cst_5 : f32 to vector<8x64xf32>
    %7 = arith.maximumf %5, %6 : vector<8x64xf32>
    %c0_6 = arith.constant 0 : index
    %c0_7 = arith.constant 0 : index
    %8 = vector.load %arg4[%c0_6, %c0_7] : memref<64x16xf32, #tpu.memory_space<vmem>>, vector<64x16xf32>
    %cst_8 = arith.constant dense<0.000000e+00> : vector<8x16xf32>
    %9 = tpu.matmul %7, %8, %cst_8 {dimension_numbers = #tpu.dot_dimension_numbers<[1], [0], [0], [1], [0, 0, 1, 1], [], []>} : vector<8x64xf32>, vector<64x16xf32>, vector<8x16xf32> -> vector<8x16xf32>
    %c0_9 = arith.constant 0 : index
    %c0_10 = arith.constant 0 : index
    %10 = vector.load %arg5[%c0_9, %c0_10] : memref<1x16xf32, #tpu.memory_space<vmem>>, vector<1x16xf32>
    %11 = vector.broadcast %10 : vector<1x16xf32> to vector<8x16xf32>
    %12 = arith.addf %9, %11 : vector<8x16xf32>
    %c0_11 = arith.constant 0 : index
    %c0_12 = arith.constant 0 : index
    %13 = vector.load %arg6[%c0_11, %c0_12] : memref<8x16xf32, #tpu.memory_space<vmem>>, vector<8x16xf32>
    tpu.vector_store %arg6[%c0_11, %c0_12], %12 {strides = array<i32>} : memref<8x16xf32, #tpu.memory_space<vmem>>, vector<8x16xf32>,
    return
  }
  func.func @transform_0(%arg0: i32) -> (i32, i32) {
    %c0_i32 = arith.constant 0 : i32
    %c0_i32_0 = arith.constant 0 : i32
    return %arg0, %c0_i32 : i32, i32
  }
  func.func @transform_1(%arg0: i32) -> (i32, i32) {
    %c0_i32 = arith.constant 0 : i32
    %c0_i32_0 = arith.constant 0 : i32
    %c0_i32_1 = arith.constant 0 : i32
    return %c0_i32, %c0_i32_0 : i32, i32
  }
  func.func @transform_2(%arg0: i32) -> (i32, i32) {
    %c0_i32 = arith.constant 0 : i32
    %c0_i32_0 = arith.constant 0 : i32
    %c0_i32_1 = arith.constant 0 : i32
    return %c0_i32, %c0_i32_0 : i32, i32
  }
  func.func @transform_3(%arg0: i32) -> (i32, i32) {
    %c0_i32 = arith.constant 0 : i32
    %c0_i32_0 = arith.constant 0 : i32
    %c0_i32_1 = arith.constant 0 : i32
    return %c0_i32, %c0_i32_0 : i32, i32
  }
  func.func @transform_4(%arg0: i32) -> (i32, i32) {
    %c0_i32 = arith.constant 0 : i32
    %c0_i32_0 = arith.constant 0 : i32
    %c0_i32_1 = arith.constant 0 : i32
    return %c0_i32, %c0_i32_0 : i32, i32
  }
  func.func @transform_5(%arg0: i32) -> (i32, i32) {
    %c0_i32 = arith.constant 0 : i32
    %c0_i32_0 = arith.constant 0 : i32
    return %arg0, %c0_i32 : i32, i32
  }
}

</mosaic_0001>

<bundles_post_ra>
// kernel: tpu_custom_call.1
= control target key start
LH: loop header
LB: loop body
LE: loop exit
PB: predicated region body
PF: predicated region fallthrough
CT: control target
= control target key end

     0   :  { %10 = vsyncpa [#allocation3], 0  ;;  %s829_s0 = inlined_call_operand.vmem [shape: f32[16,32], index: 0, kind: input, shape index: {}]   ;;  %s830_s1 = inlined_call_operand.vmem [shape: f32[32,64], index: 1, kind: input, shape index: {}]   ;;  %s831_s2 = inlined_call_operand.vmem [shape: f32[1,64], index: 2, kind: input, shape index: {}]   ;;  %s832_s3 = inlined_call_operand.vmem [shape: f32[64,16], index: 3, kind: input, shape index: {}]   ;;  %s833_s4 = inlined_call_operand.vmem [shape: f32[1,16], index: 4, kind: input, shape index: {}]   ;;  %s834_s5 = inlined_call_operand.hbm [shape: f32[16,16], index: 5, kind: output, shape index: {}]  }
   0x1   :  { %12 = vsyncpa [#allocation3 + $0x1], 0  ;;  %s687_s18 = smov 0   ;;  %s689_s19 = smov 0  }
   0x2   :  { %s691_s20 = smov 0   ;;  %s693_s21 = smov 0  }
   0x3 LB: > { %s708_s22 = sadd.s32 4294967295, %s651_s21   ;;  %s471_s23 = sadd.s32 4294967294, %s651_s21   ;;  %s651_s21 = sphi %s693_s21, %s840_s21   ;;  %s647_s20 = sphi %s691_s20, %s839_s20   ;;  %s643_s19 = sphi %s689_s19, %s838_s19   ;;  %s639_s18 = sphi %s687_s18, %s837_s18  }
   0x4   : > { %s712_s24 = sadd.s32 1, %s651_s21   ;;  %s135_s25 = sadd.s32 1, %s647_s20 }
   0x5   : > { %s132_s26 = ssub.s32 %s651_s21, %s712_s24  ;;  %p145_p0 = scmp.ne.s32.totalorder %s647_s20, %s643_s19 }
   0x6   : > { %p133_p1 = scmp.eq.s32.totalorder %s132_s26, 0  ;;  %p146_p2 = scmp.eq.s32.totalorder %s708_s22, 1 }
   0x7   : > { %p151_p3 = scmp.ne.s32.totalorder %s643_s19, %s639_s18  ;;  %p152_p4 = scmp.eq.s32.totalorder %s471_s23, 1 }
   0x8   : > { %s723_s27 = scalar_select %p133_p1, %s647_s20, %s135_s25  }
   0x9   : > { %p725_p5 = por %p146_p2, %p145_p0  ;;  %p729_p6 = por %p152_p4, %p151_p3 }
   0xa   : > { %p474_p7 = scmp.ge.s32.totalorder %s651_s21, 1  ;;  %p189_p8 = scmp.lt.s32.totalorder %s651_s21, 3 }
   0xc   : > { %p190_p9 = pnand %p474_p7, %p189_p8 }
   0xd   : > { %v221_v0 = vld [vmem:[%s830_s1] sm:$0xff] (!%p190_p9)  ;;  %v222_v1 = vld [vmem:[%s830_s1 + $0x8] sm:$0xff] (!%p190_p9)  ;;  %v223_v2 = vld [vmem:[%s830_s1 + $0x10] sm:$0xff] (!%p190_p9)  ;;  %v653_v3 = vmov (!%p190_p9), 0.0|0.0   ;;  %vm654_vm0 = vmmov (!%p190_p9), 0   ;;  %v655_v6 = vmov (!%p190_p9), 0.0  }
   0xe   : > { %193 = sbr.rel (%p190_p9) target bundleno = 470 (0x1d6), region = 40  ;;  %529 = vmatprep.subr.bf16.mxu0 (!%p190_p9), %v653_v3  ;;  %v530_v4 = vpack.c.bf16 (!%p190_p9), %v222_v1, %v221_v0  ;;  %v224_v5 = vld [vmem:[%s830_s1 + $0x18] sm:$0xff] (!%p190_p9)  ;;  %507 = vmatprep.mubr.msk.f32.mxu0 (!%p190_p9), %vm654_vm0, %v655_v6  ;;  %p216_p10 = scmp.lt.s32.totalorder (!%p190_p9), %s708_s22, 1  ;;  %v307_v7 = vld [vmem:[%s832_s3] sm:$0xff] (!%p190_p9)  ;;  %v308_v8 = vld [vmem:[%s832_s3 + $0x8] sm:$0xff] (!%p190_p9)  ;;  %vm232_vm1 = vcmask (!%p190_p9), 261120  }
   0xf   : > { %535 = vmatprep.subr.bf16.mxu1 (!%p190_p9), %v653_v3  ;;  %v536_v9 = vpack.c.bf16 (!%p190_p9), %v308_v8, %v307_v7  ;;  %v309_v10 = vld [vmem:[%s832_s3 + $0x10] sm:$0xff] (!%p190_p9)  ;;  %v310_v11 = vld [vmem:[%s832_s3 + $0x18] sm:$0xff] (!%p190_p9)  ;;  %526 = vmatprep.mubr.msk.f32.mxu1 (!%p190_p9), %vm654_vm0, %v655_v6  ;;  %v533_v12 = vpack.c.bf16 (!%p190_p9), %v224_v5, %v223_v2  ;;  %v311_v14 = vld [vmem:[%s832_s3 + $0x20] sm:$0xff] (!%p190_p9)  ;;  %vm322_vm2 = vcmask (!%p190_p9), 523264   ;;  %s213_s26 = sand.u32 (!%p190_p9), 1, %s643_s19   ;;  %s482_s8 = sshll.u32 (!%p190_p9), %s708_s22, 7 }
  0x10   : > { %531 = vmatpush3.bf16.msra.mxu0 (!%p190_p9), %v530_v4  ;;  %v539_v13 = vpack.c.bf16 (!%p190_p9), %v310_v11, %v309_v10  ;;  %v312_v15 = vld [vmem:[%s832_s3 + $0x28] sm:$0xff] (!%p190_p9)  ;;  %v313_v18 = vld [vmem:[%s832_s3 + $0x30] sm:$0xff] (!%p190_p9)  ;;  %v314_v19 = vld [vmem:[%s832_s3 + $0x38] sm:$0xff] (!%p190_p9)  ;;  %vm396_vm3 = vcmask (!%p190_p9), 130048   ;;  %s399_s14 = scalar_lea.sflag (!%p190_p9), [#allocation3], %s213_s26 }
  0x11   : > { %532 = vmatprep.subr.bf16.mxu0 (!%p190_p9), %v653_v3  ;;  %537 = vmatpush3.bf16.msra.mxu1 (!%p190_p9), %v536_v9  ;;  %v542_v17 = vpack.c.bf16 (!%p190_p9), %v312_v15, %v311_v14  ;;  %v545_v20 = vpack.c.bf16 (!%p190_p9), %v314_v19, %v313_v18  ;;  %v477_v21 = vld [vmem:[%s831_s2] ss:$0 sm:$0xff] (!%p190_p9) }
  0x12   : > { %538 = vmatprep.subr.bf16.mxu1 (!%p190_p9), %v653_v3  ;;  %v479_v26 = vld [vmem:[%s833_s4] ss:$0 sm:$0xff] (!%p190_p9) }
  0x14   : > { %534 = vmatpush3.bf16.msra.mxu0 (!%p190_p9), %v533_v12 }
  0x15   : > { %s217_s30 = scalar_select %p216_p10, %s708_s22, 1  ;;  %540 = vmatpush3.bf16.msra.mxu1 %v539_v13 }
  0x16   : > { %541 = vmatprep.subr.bf16.mxu1 %v653_v3  ;;  %s656_s22 = smov [#allocation2]  }
  0x17   : > { %s476_s6 = sshll.u32 %s217_s30, 3  ;;  %s475_s30 = sshll.u32 %s213_s26, 3 }
  0x18   : > { %s219_s13 = scalar_lea.vmem %s829_s0, %s476_s6  ;;  %s215_s9 = scalar_lea.vmem [#allocation2], %s475_s30 }
  0x19   : > { %v220_v16 = vld [vmem:[%s219_s13] sm:$0xff]  ;;  %543 = vmatpush3.bf16.msra.mxu1 %v542_v17  ;;  %s412_s10 = sshll.u32 %s215_s9, 4  ;;  %s787_s13 = scalar_lea.hbm %s834_s5, %s482_s8  ;;  %s789_s10 = int_to_ptr.vmem [resolvable:$true] %s412_s10 }
  0x1a   : > { %508 = vmatmul.mubr.msk.f32.vlgmr.msra.gmra.mrb[0].mxu0 %vm232_vm1, %v220_v16  ;;  %544 = vmatprep.subr.bf16.mxu1 %v653_v3  ;;  %s589_s15 = scalar_lea.vmem %s789_s10, 128  ;;  %s593_s16 = sshll.u32 %s656_s22, 4  ;;  %s594_s16 = int_to_ptr.vmem [resolvable:$false] %s593_s16 }
  0x1b   : > { %p590_p11 = scmp.ne.s32.totalorder %s789_s10, %s589_s15  ;;  %s595_s17 = scalar_lea.vmem %s594_s16, 256 }
  0x1c   : > { %p596_p0 = scmp.lt.s32.totalorder %s789_s10, %s594_s16  ;;  %p597_p1 = scmp.lt.s32.totalorder %s595_s17, %s589_s15 }
  0x1d   : > { %546 = vmatpush3.bf16.msra.mxu1 %v545_v20  ;;  %p591_p12 = pnand %p590_p11, %p725_p5 }
  0x1e   : > { %p598_p2 = por %p597_p1, %p596_p0 }
  0x1f   : > { %p592_p13 = pneg %p591_p12 }
  0x21   : > { %p599_p3 = pnand %p598_p2, %p592_p13 }
  0xed   : > { %v302_v22 = vpop.f32.mrb[0].mxu0 }
  0xee   : > { %v303_v23 = vadd.f32 %v477_v21, %v302_v22  ;;  %v509_v24 = vpop.f32.mrb[1].mxu0 }
  0xf0   : > { %v306_v25 = vmax.f32 %v303_v23, 0.0 }
  0xf2   : > { %527 = vmatmul.mubr.msk.f32.vlgmr.msra.gmra.mrb[0].mxu1 %vm322_vm2, %v306_v25 }
 0x1c5   : > { %v392_v27 = vpop.f32.mrb[0].mxu1 }
 0x1c6   : > { %v393_v28 = vadd.f32 %v479_v26, %v392_v27  ;;  %v528_v29 = vpop.f32.mrb[1].mxu1 }
 0x1c8   : > { %397 = vst.msk [vmem:[%s215_s9] sm:$0xff] %vm396_vm3, %v393_v28 }
 0x1c9   : > { %602 = shalt.err (!%p599_p3)
}
 0x1ca   : > { %s603_s23 = scalar_lea.hbm %s787_s13, 128  ;;  %s607_s30 = scalar_lea.hbm %s834_s5, 256 }
 0x1cb   : > { %p604_p4 = scmp.ne.s32.totalorder %s787_s13, %s603_s23  ;;  %p608_p9 = scmp.lt.u32.totalorder %s787_s13, %s834_s5 }
 0x1cc   : > { %p609_p10 = scmp.lt.u32.totalorder %s607_s30, %s603_s23  ;;  %p611_p12 = scmp.lt.u32.totalorder %s603_s23, %s787_s13 }
 0x1cd   : > { %p605_p7 = pnand %p604_p4, %p725_p5 }
 0x1ce   : > { %p610_p11 = por %p609_p10, %p608_p9 }
 0x1cf   : > { %p606_p8 = pneg %p605_p7 }
 0x1d0   : > { %p612_p13 = por %p611_p12, %p610_p11 }
 0x1d2   : > { %p613_p0 = pnand %p612_p13, %p606_p8 }
 0x1d4   : > { %616 = shalt.err (!%p613_p0)
}
 0x1d5   : > { %547 = dma.vmem_to_hbm [thread:$0]  (%p725_p5), %s789_s10, 128, %s787_s13, %s399_s14  }
 0x1d6 PF: > { %p553_p1 = scmp.ge.s32.totalorder %s651_s21, 2  ;;  %s424_s8 = sand.u32 1, %s639_s18  }
 0x1d7   : > { %s425_s9 = scalar_lea.sflag [#allocation3], %s424_s8 }
 0x1d8   : > { %p550_p2 = pnand %p553_p1, %p729_p6 }
 0x1da   : > { %634 = dma.done.wait (!%p550_p2), %s425_s9, 128  }
 0x1db   : > { %636 = vsyncadd (!%p550_p2), %s425_s9, 4294967168  ;;  %p15_p3 = scmp.ge.s32.totalorder %s712_s24, 4   ;;  %s837_s18 = smov %s643_s19 }
 0x1dc   : > { %s838_s19 = smov %s647_s20  ;;  %s839_s20 = smov %s723_s27 }
 0x1dd   : > { %s840_s21 = smov %s712_s24  ;;  %17 = sbr.rel (!%p15_p3) target bundleno = 3 (0x3), region = 75 }
 0x1e4   :  { %430 = vsyncpa [#allocation3], 1 }
 0x1e5   :  { %432 = vsyncpa [#allocation3 + $0x1], 1 }

// kernel: tpu_custom_call.1
= control target key start
LH: loop header
LB: loop body
LE: loop exit
PB: predicated region body
PF: predicated region fallthrough
CT: control target
= control target key end

     0   :  { %10 = vsyncpa [#allocation3], 0  ;;  %s829_s0 = inlined_call_operand.vmem [shape: f32[16,32], index: 0, kind: input, shape index: {}]   ;;  %s830_s1 = inlined_call_operand.vmem [shape: f32[32,64], index: 1, kind: input, shape index: {}]   ;;  %s831_s2 = inlined_call_operand.vmem [shape: f32[1,64], index: 2, kind: input, shape index: {}]   ;;  %s832_s3 = inlined_call_operand.vmem [shape: f32[64,16], index: 3, kind: input, shape index: {}]   ;;  %s833_s4 = inlined_call_operand.vmem [shape: f32[1,16], index: 4, kind: input, shape index: {}]   ;;  %s834_s5 = inlined_call_operand.hbm [shape: f32[16,16], index: 5, kind: output, shape index: {}]  }
   0x1   :  { %12 = vsyncpa [#allocation3 + $0x1], 0  ;;  %s687_s18 = smov 0   ;;  %s689_s19 = smov 0  }
   0x2   :  { %s691_s20 = smov 0   ;;  %s693_s21 = smov 0  }
   0x3 LB: > { %s708_s22 = sadd.s32 4294967295, %s651_s21   ;;  %s471_s23 = sadd.s32 4294967294, %s651_s21   ;;  %s651_s21 = sphi %s693_s21, %s840_s21   ;;  %s647_s20 = sphi %s691_s20, %s839_s20   ;;  %s643_s19 = sphi %s689_s19, %s838_s19   ;;  %s639_s18 = sphi %s687_s18, %s837_s18  }
   0x4   : > { %s712_s24 = sadd.s32 1, %s651_s21   ;;  %s135_s25 = sadd.s32 1, %s647_s20 }
   0x5   : > { %s132_s26 = ssub.s32 %s651_s21, %s712_s24  ;;  %p145_p0 = scmp.ne.s32.totalorder %s647_s20, %s643_s19 }
   0x6   : > { %p133_p1 = scmp.eq.s32.totalorder %s132_s26, 0  ;;  %p146_p2 = scmp.eq.s32.totalorder %s708_s22, 1 }
   0x7   : > { %p151_p3 = scmp.ne.s32.totalorder %s643_s19, %s639_s18  ;;  %p152_p4 = scmp.eq.s32.totalorder %s471_s23, 1 }
   0x8   : > { %s723_s27 = scalar_select %p133_p1, %s647_s20, %s135_s25  }
   0x9   : > { %p725_p5 = por %p146_p2, %p145_p0  ;;  %p729_p6 = por %p152_p4, %p151_p3 }
   0xa   : > { %p474_p7 = scmp.ge.s32.totalorder %s651_s21, 1  ;;  %p189_p8 = scmp.lt.s32.totalorder %s651_s21, 3 }
   0xc   : > { %p190_p9 = pnand %p474_p7, %p189_p8 }
   0xd   : > { %v221_v0 = vld [vmem:[%s830_s1] sm:$0xff] (!%p190_p9)  ;;  %v222_v1 = vld [vmem:[%s830_s1 + $0x8] sm:$0xff] (!%p190_p9)  ;;  %v223_v2 = vld [vmem:[%s830_s1 + $0x10] sm:$0xff] (!%p190_p9)  ;;  %v653_v3 = vmov (!%p190_p9), 0.0|0.0   ;;  %vm654_vm0 = vmmov (!%p190_p9), 0   ;;  %v655_v6 = vmov (!%p190_p9), 0.0  }
   0xe   : > { %193 = sbr.rel (%p190_p9) target bundleno = 470 (0x1d6), region = 40  ;;  %529 = vmatprep.subr.bf16.mxu0 (!%p190_p9), %v653_v3  ;;  %v530_v4 = vpack.c.bf16 (!%p190_p9), %v222_v1, %v221_v0  ;;  %v224_v5 = vld [vmem:[%s830_s1 + $0x18] sm:$0xff] (!%p190_p9)  ;;  %507 = vmatprep.mubr.msk.f32.mxu0 (!%p190_p9), %vm654_vm0, %v655_v6  ;;  %p216_p10 = scmp.lt.s32.totalorder (!%p190_p9), %s708_s22, 1  ;;  %v307_v7 = vld [vmem:[%s832_s3] sm:$0xff] (!%p190_p9)  ;;  %v308_v8 = vld [vmem:[%s832_s3 + $0x8] sm:$0xff] (!%p190_p9)  ;;  %vm232_vm1 = vcmask (!%p190_p9), 261120  }
   0xf   : > { %535 = vmatprep.subr.bf16.mxu1 (!%p190_p9), %v653_v3  ;;  %v536_v9 = vpack.c.bf16 (!%p190_p9), %v308_v8, %v307_v7  ;;  %v309_v10 = vld [vmem:[%s832_s3 + $0x10] sm:$0xff] (!%p190_p9)  ;;  %v310_v11 = vld [vmem:[%s832_s3 + $0x18] sm:$0xff] (!%p190_p9)  ;;  %526 = vmatprep.mubr.msk.f32.mxu1 (!%p190_p9), %vm654_vm0, %v655_v6  ;;  %v533_v12 = vpack.c.bf16 (!%p190_p9), %v224_v5, %v223_v2  ;;  %v311_v14 = vld [vmem:[%s832_s3 + $0x20] sm:$0xff] (!%p190_p9)  ;;  %vm322_vm2 = vcmask (!%p190_p9), 523264   ;;  %s213_s26 = sand.u32 (!%p190_p9), 1, %s643_s19   ;;  %s482_s8 = sshll.u32 (!%p190_p9), %s708_s22, 7 }
  0x10   : > { %531 = vmatpush3.bf16.msra.mxu0 (!%p190_p9), %v530_v4  ;;  %v539_v13 = vpack.c.bf16 (!%p190_p9), %v310_v11, %v309_v10  ;;  %v312_v15 = vld [vmem:[%s832_s3 + $0x28] sm:$0xff] (!%p190_p9)  ;;  %v313_v18 = vld [vmem:[%s832_s3 + $0x30] sm:$0xff] (!%p190_p9)  ;;  %v314_v19 = vld [vmem:[%s832_s3 + $0x38] sm:$0xff] (!%p190_p9)  ;;  %vm396_vm3 = vcmask (!%p190_p9), 130048   ;;  %s399_s14 = scalar_lea.sflag (!%p190_p9), [#allocation3], %s213_s26 }
  0x11   : > { %532 = vmatprep.subr.bf16.mxu0 (!%p190_p9), %v653_v3  ;;  %537 = vmatpush3.bf16.msra.mxu1 (!%p190_p9), %v536_v9  ;;  %v542_v17 = vpack.c.bf16 (!%p190_p9), %v312_v15, %v311_v14  ;;  %v545_v20 = vpack.c.bf16 (!%p190_p9), %v314_v19, %v313_v18  ;;  %v477_v21 = vld [vmem:[%s831_s2] ss:$0 sm:$0xff] (!%p190_p9) }
  0x12   : > { %538 = vmatprep.subr.bf16.mxu1 (!%p190_p9), %v653_v3  ;;  %v479_v26 = vld [vmem:[%s833_s4] ss:$0 sm:$0xff] (!%p190_p9) }
  0x14   : > { %534 = vmatpush3.bf16.msra.mxu0 (!%p190_p9), %v533_v12 }
  0x15   : > { %s217_s30 = scalar_select %p216_p10, %s708_s22, 1  ;;  %540 = vmatpush3.bf16.msra.mxu1 %v539_v13 }
  0x16   : > { %541 = vmatprep.subr.bf16.mxu1 %v653_v3  ;;  %s656_s22 = smov [#allocation2]  }
  0x17   : > { %s476_s6 = sshll.u32 %s217_s30, 3  ;;  %s475_s30 = sshll.u32 %s213_s26, 3 }
  0x18   : > { %s219_s13 = scalar_lea.vmem %s829_s0, %s476_s6  ;;  %s215_s9 = scalar_lea.vmem [#allocation2], %s475_s30 }
  0x19   : > { %v220_v16 = vld [vmem:[%s219_s13] sm:$0xff]  ;;  %543 = vmatpush3.bf16.msra.mxu1 %v542_v17  ;;  %s412_s10 = sshll.u32 %s215_s9, 4  ;;  %s787_s13 = scalar_lea.hbm %s834_s5, %s482_s8  ;;  %s789_s10 = int_to_ptr.vmem [resolvable:$true] %s412_s10 }
  0x1a   : > { %508 = vmatmul.mubr.msk.f32.vlgmr.msra.gmra.mrb[0].mxu0 %vm232_vm1, %v220_v16  ;;  %544 = vmatprep.subr.bf16.mxu1 %v653_v3  ;;  %s589_s15 = scalar_lea.vmem %s789_s10, 128  ;;  %s593_s16 = sshll.u32 %s656_s22, 4  ;;  %s594_s16 = int_to_ptr.vmem [resolvable:$false] %s593_s16 }
  0x1b   : > { %p590_p11 = scmp.ne.s32.totalorder %s789_s10, %s589_s15  ;;  %s595_s17 = scalar_lea.vmem %s594_s16, 256 }
  0x1c   : > { %p596_p0 = scmp.lt.s32.totalorder %s789_s10, %s594_s16  ;;  %p597_p1 = scmp.lt.s32.totalorder %s595_s17, %s589_s15 }
  0x1d   : > { %546 = vmatpush3.bf16.msra.mxu1 %v545_v20  ;;  %p591_p12 = pnand %p590_p11, %p725_p5 }
  0x1e   : > { %p598_p2 = por %p597_p1, %p596_p0 }
  0x1f   : > { %p592_p13 = pneg %p591_p12 }
  0x21   : > { %p599_p3 = pnand %p598_p2, %p592_p13 }
  0xed   : > { %v302_v22 = vpop.f32.mrb[0].mxu0 }
  0xee   : > { %v303_v23 = vadd.f32 %v477_v21, %v302_v22  ;;  %v509_v24 = vpop.f32.mrb[1].mxu0 }
  0xf0   : > { %v306_v25 = vmax.f32 %v303_v23, 0.0 }
  0xf2   : > { %527 = vmatmul.mubr.msk.f32.vlgmr.msra.gmra.mrb[0].mxu1 %vm322_vm2, %v306_v25 }
 0x1c5   : > { %v392_v27 = vpop.f32.mrb[0].mxu1 }
 0x1c6   : > { %v393_v28 = vadd.f32 %v479_v26, %v392_v27  ;;  %v528_v29 = vpop.f32.mrb[1].mxu1 }
 0x1c8   : > { %397 = vst.msk [vmem:[%s215_s9] sm:$0xff] %vm396_vm3, %v393_v28 }
 0x1c9   : > { %602 = shalt.err (!%p599_p3)
}
 0x1ca   : > { %s603_s23 = scalar_lea.hbm %s787_s13, 128  ;;  %s607_s30 = scalar_lea.hbm %s834_s5, 256 }
 0x1cb   : > { %p604_p4 = scmp.ne.s32.totalorder %s787_s13, %s603_s23  ;;  %p608_p9 = scmp.lt.u32.totalorder %s787_s13, %s834_s5 }
 0x1cc   : > { %p609_p10 = scmp.lt.u32.totalorder %s607_s30, %s603_s23  ;;  %p611_p12 = scmp.lt.u32.totalorder %s603_s23, %s787_s13 }
 0x1cd   : > { %p605_p7 = pnand %p604_p4, %p725_p5 }
 0x1ce   : > { %p610_p11 = por %p609_p10, %p608_p9 }
 0x1cf   : > { %p606_p8 = pneg %p605_p7 }
 0x1d0   : > { %p612_p13 = por %p611_p12, %p610_p11 }
 0x1d2   : > { %p613_p0 = pnand %p612_p13, %p606_p8 }
 0x1d4   : > { %616 = shalt.err (!%p613_p0)
}
 0x1d5   : > { %547 = dma.vmem_to_hbm [thread:$0]  (%p725_p5), %s789_s10, 128, %s787_s13, %s399_s14  }
 0x1d6 PF: > { %p553_p1 = scmp.ge.s32.totalorder %s651_s21, 2  ;;  %s424_s8 = sand.u32 1, %s639_s18  }
 0x1d7   : > { %s425_s9 = scalar_lea.sflag [#allocation3], %s424_s8 }
 0x1d8   : > { %p550_p2 = pnand %p553_p1, %p729_p6 }
 0x1da   : > { %634 = dma.done.wait (!%p550_p2), %s425_s9, 128  }
 0x1db   : > { %636 = vsyncadd (!%p550_p2), %s425_s9, 4294967168  ;;  %p15_p3 = scmp.ge.s32.totalorder %s712_s24, 4   ;;  %s837_s18 = smov %s643_s19 }
 0x1dc   : > { %s838_s19 = smov %s647_s20  ;;  %s839_s20 = smov %s723_s27 }
 0x1dd   : > { %s840_s21 = smov %s712_s24  ;;  %17 = sbr.rel (!%p15_p3) target bundleno = 3 (0x3), region = 75 }
 0x1e4   :  { %430 = vsyncpa [#allocation3], 1 }
 0x1e5   :  { %432 = vsyncpa [#allocation3 + $0x1], 1 }

</bundles_post_ra>
